<compile_context>
chip_gen: v7x
topology: tpu7x:2x2x1
jax: 0.10.0
libtpu: 0.0.40
codegen_flags: <defaults>
</compile_context>

<pallas_src>
import functools

import jax
import jax.numpy as jnp
from jax.experimental import pallas as pl
from jax.experimental.pallas import tpu as pltpu

EPS = 1e-5


def _sublane_multiple(dtype) -> int:
    itemsize = jnp.dtype(dtype).itemsize
    return {4: 8, 2: 16, 1: 32}.get(itemsize, 8)


@functools.lru_cache(maxsize=None)
def _hw_params():
    """Generation-aware (vmem_limit_bytes, per_step_vmem_budget, num_tensorcores)."""
    vmem_cap = None
    num_tc = None
    try:
        info = pltpu.get_tpu_info()
        cap = getattr(info, "vmem_capacity_bytes", None)
        if cap:
            vmem_cap = int(cap)
        for attr in ("num_tensorcores", "tensorcores_per_chip", "num_cores", "core_count"):
            v = getattr(info, attr, None)
            if v:
                num_tc = int(v)
                break
    except Exception:
        pass
    if vmem_cap is None:
        vmem_cap = 64 << 20          # conservative fallback: smallest (v7x-sized) VMEM
    if num_tc is None:
        num_tc = 2 if vmem_cap < (96 << 20) else 1
    if vmem_cap >= (96 << 20):       # v5e / v6e: 128 MiB VMEM, single TensorCore
        return 64 << 20, 48 << 20, num_tc
    else:                            # v7x: 64 MiB VMEM per TC, 2 TensorCores
        return 48 << 20, 32 << 20, max(num_tc, 2)


@functools.lru_cache(maxsize=None)
def _has_bf16_valu() -> bool:
    """v6e/v7x VALUs are bf16-capable; v5e and earlier are not."""
    name = ""
    try:
        info = pltpu.get_tpu_info()
        name = str(getattr(info, "chip_version", "") or "")
    except Exception:
        pass
    if not name:
        try:
            name = jax.devices()[0].device_kind
        except Exception:
            name = ""
    name = name.lower()
    return not any(tag in name for tag in ("v2", "v3", "v4", "v5"))


def _pick_tile_rows(rows: int, d: int, dtype, step_budget_bytes: int, num_tc: int) -> int:
    """Largest sublane-aligned row tile whose per-grid-step VMEM footprint
    (double-buffered input + output + f32 intermediates) fits the budget; on
    multi-TensorCore chips also keep >= 4 grid steps per core when rows allow."""
    sub = _sublane_multiple(dtype)
    itemsize = jnp.dtype(dtype).itemsize
    # 2x input buf + 2x output buf + ~2 f32 intermediates (centered tile, square).
    bytes_per_elem = 2 * itemsize + 2 * itemsize + 2 * 4
    t = step_budget_bytes // max(1, d * bytes_per_elem)
    t = max(sub, (t // sub) * sub)

    if num_tc > 1:
        # >= 4 steps per TensorCore so each core's DMAs stay double-buffered.
        min_steps = 4 * num_tc
        per_step = pl.cdiv(rows, min_steps)
        per_step = max(sub, ((per_step + sub - 1) // sub) * sub)
        t = min(t, per_step)

    rows_up = ((rows + sub - 1) // sub) * sub
    return int(min(t, max(sub, rows_up)))


def _ln_math(x, w, b, out_dtype, affine_dtype):
    d = x.shape[-1]
    inv_d = jnp.float32(1.0 / d)
    # Pass 1: mean, accumulated in f32 directly off the loaded tile.
    mean = jnp.sum(x, axis=-1, dtype=jnp.float32, keepdims=True) * inv_d
    # Pass 2: centered second moment (two-pass; avoids E[x^2]-mean^2 cancellation;
    # the tile is VMEM-resident so this only costs VPU time).
    centered = x.astype(jnp.float32) - mean
    var = jnp.sum(centered * centered, axis=-1, keepdims=True) * inv_d
    inv = jax.lax.rsqrt(var + jnp.float32(EPS))
    # Scale + affine in `affine_dtype` (bf16 on v6e/v7x when I/O is bf16,
    # relieving the f32 VALU slot that binds on v7x; f32 otherwise).
    y = (centered * inv).astype(affine_dtype) * w
    if b is not None:
        y = y + b
    return y.astype(out_dtype)


def _layernorm_kernel_bias(x_ref, w_ref, b_ref, o_ref, *, affine_dtype):
    o_ref[...] = _ln_math(x_ref[...], w_ref[...], b_ref[...], o_ref.dtype, affine_dtype)


def _layernorm_kernel_nobias(x_ref, w_ref, o_ref, *, affine_dtype):
    o_ref[...] = _ln_math(x_ref[...], w_ref[...], None, o_ref.dtype, affine_dtype)


@functools.partial(jax.jit, static_argnames=("tile_rows",))
def layer_norm(x, weight, bias=None, *, tile_rows=None):
    """LayerNorm over the last axis of x, matching F.layer_norm(..., eps=1e-5)."""
    orig_shape = x.shape
    D = orig_shape[-1]
    rows = 1
    for s in orig_shape[:-1]:
        rows *= s
    x2 = x.reshape(rows, D)

    vmem_limit, step_budget, num_tc = _hw_params()
    if tile_rows is None:
        tile_rows = _pick_tile_rows(rows, D, x.dtype, step_budget, num_tc)

    # No padding: Pallas masks the partial last block; rows are independent so
    # garbage tail rows cannot pollute valid rows and OOB writes are dropped.
    grid = (pl.cdiv(rows, tile_rows),)

    # Affine dtype: bf16 only when the I/O dtype is bf16 on a bf16-VALU chip.
    if x.dtype == jnp.bfloat16 and _has_bf16_valu():
        affine_dtype = jnp.bfloat16
    else:
        affine_dtype = jnp.float32

    # Pre-cast params once in the wrapper; they stay resident across the grid.
    w2 = weight.astype(affine_dtype).reshape(1, D)
    param_spec = pl.BlockSpec((1, D), lambda i: (0, 0))
    # NOTE: for D % 128 != 0 (e.g. D=32) lanes are underutilized and output
    # stores are masked; packing independent rows along lanes would help
    # throughput for that shape class, but correctness is unaffected.
    row_spec = pl.BlockSpec((tile_rows, D), lambda i: (i, 0))

    compiler_params = pltpu.CompilerParams(
        dimension_semantics=("parallel",),
        vmem_limit_bytes=vmem_limit,
    )

    if bias is not None:
        b2 = bias.astype(affine_dtype).reshape(1, D)
        kernel = functools.partial(_layernorm_kernel_bias, affine_dtype=affine_dtype)
        in_specs = [row_spec, param_spec, param_spec]
        args = (x2, w2, b2)
    else:
        kernel = functools.partial(_layernorm_kernel_nobias, affine_dtype=affine_dtype)
        in_specs = [row_spec, param_spec]
        args = (x2, w2)

    out2 = pl.pallas_call(
        kernel,
        out_shape=jax.ShapeDtypeStruct((rows, D), x.dtype),
        grid_spec=pltpu.PrefetchScalarGridSpec(
            num_scalar_prefetch=0,
            grid=grid,
            in_specs=in_specs,
            out_specs=row_spec,
        ),
        compiler_params=compiler_params,
    )(*args)

    return out2.reshape(orig_shape)


def _reference_layer_norm(x, weight, bias):
    xf = x.astype(jnp.float32)
    mean = jnp.mean(xf, axis=-1, keepdims=True)
    var = jnp.mean((xf - mean) ** 2, axis=-1, keepdims=True)
    y = (xf - mean) / jnp.sqrt(var + EPS)
    y = y * weight.astype(jnp.float32)
    if bias is not None:
        y = y + bias.astype(jnp.float32)
    return y.astype(x.dtype)


if __name__ == "__main__":
    key = jax.random.PRNGKey(0)
    batch, seq, hidden = 2, 8, 32

    x = jax.random.normal(key, (batch, seq, hidden), dtype=jnp.float32)

    # Deterministic parameter init, mirroring nn.Parameter(torch.ones/zeros(ndim)).
    weight = jnp.ones((hidden,), dtype=jnp.float32)
    bias = jnp.zeros((hidden,), dtype=jnp.float32)

    # Case 1: bias=True
    out = layer_norm(x, weight, bias)
    jax.block_until_ready(out)
    ref = _reference_layer_norm(x, weight, bias)
    assert jnp.allclose(out, ref, atol=1e-5, rtol=1e-5), "bias=True mismatch"

    # Case 2: bias=False (optional-bias branch)
    out_nb = layer_norm(x, weight, None)
    jax.block_until_ready(out_nb)
    ref_nb = _reference_layer_norm(x, weight, None)
    assert jnp.allclose(out_nb, ref_nb, atol=1e-5, rtol=1e-5), "bias=False mismatch"

    # Case 3: ragged row count (rows=21) exercises the partial-last-block path
    # (no jnp.pad / slice) with non-trivial parameters.
    key2, key3, key4 = jax.random.split(jax.random.PRNGKey(0), 3)
    x_big = jax.random.normal(key2, (3, 7, 256), dtype=jnp.float32)
    w_big = jax.random.normal(key3, (256,), dtype=jnp.float32)
    b_big = jax.random.normal(key4, (256,), dtype=jnp.float32)
    out_big = layer_norm(x_big, w_big, b_big)
    jax.block_until_ready(out_big)
    ref_big = _reference_layer_norm(x_big, w_big, b_big)
    assert jnp.allclose(out_big, ref_big, atol=1e-4, rtol=1e-4), "ragged-rows mismatch"

    # Case 4: bf16 I/O exercises the generation-gated bf16 affine path.
    x_bf = jax.random.normal(jax.random.PRNGKey(1), (4, 16, 128),
                             dtype=jnp.float32).astype(jnp.bfloat16)
    w_bf = jnp.ones((128,), dtype=jnp.bfloat16)
    b_bf = jnp.zeros((128,), dtype=jnp.bfloat16)
    out_bf = layer_norm(x_bf, w_bf, b_bf)
    jax.block_until_ready(out_bf)
    ref_bf = _reference_layer_norm(x_bf, w_bf, b_bf)
    assert jnp.allclose(out_bf.astype(jnp.float32), ref_bf.astype(jnp.float32),
                        atol=5e-2, rtol=5e-2), "bf16 mismatch"

    print("KERNEL_OK")
</pallas_src>

<mosaic_0001>
module attributes {stable_mosaic.version = 11 : i64} {
  func.func @_layernorm_kernel_bias(%arg0: i32, %arg1: memref<8x32xf32, #tpu.memory_space<vmem>>, %arg2: memref<1x32xf32, #tpu.memory_space<vmem>>, %arg3: memref<1x32xf32, #tpu.memory_space<vmem>>, %arg4: memref<8x32xf32, #tpu.memory_space<vmem>>) attributes {dimension_semantics = [#tpu.dimension_semantics<parallel>], iteration_bounds = array<i64: 2>, scalar_prefetch = 0 : i64, scratch_operands = 0 : i64, tpu.core_type = #tpu.core_type<tc>, window_params = [{transform_indices = @transform_0, window_bounds = array<i64: 8, 32>}, {pipeline_mode = #tpu.pipeline_mode<synchronous>, transform_indices = @transform_1, window_bounds = array<i64: 1, 32>}, {pipeline_mode = #tpu.pipeline_mode<synchronous>, transform_indices = @transform_2, window_bounds = array<i64: 1, 32>}, {transform_indices = @transform_3, window_bounds = array<i64: 8, 32>}]} {
    %c0 = arith.constant 0 : index
    %c0_0 = arith.constant 0 : index
    %0 = vector.load %arg1[%c0, %c0_0] : memref<8x32xf32, #tpu.memory_space<vmem>>, vector<8x32xf32>
    %c0_1 = arith.constant 0 : index
    %c0_2 = arith.constant 0 : index
    %1 = vector.load %arg2[%c0_1, %c0_2] : memref<1x32xf32, #tpu.memory_space<vmem>>, vector<1x32xf32>
    %c0_3 = arith.constant 0 : index
    %c0_4 = arith.constant 0 : index
    %2 = vector.load %arg3[%c0_3, %c0_4] : memref<1x32xf32, #tpu.memory_space<vmem>>, vector<1x32xf32>
    %cst = arith.constant dense<0.000000e+00> : vector<8xf32>
    %3 = vector.multi_reduction <add>, %0, %cst [1] : vector<8x32xf32> to vector<8xf32>
    %4 = vector.shape_cast %3 : vector<8xf32> to vector<8x1xf32>
    %cst_5 = arith.constant 3.125000e-02 : f32
    %5 = vector.broadcast %cst_5 : f32 to vector<8x1xf32>
    %6 = arith.mulf %4, %5 : vector<8x1xf32>
    %7 = vector.broadcast %6 : vector<8x1xf32> to vector<8x32xf32>
    %8 = arith.subf %0, %7 : vector<8x32xf32>
    %9 = arith.mulf %8, %8 : vector<8x32xf32>
    %cst_6 = arith.constant dense<0.000000e+00> : vector<8xf32>
    %10 = vector.multi_reduction <add>, %9, %cst_6 [1] : vector<8x32xf32> to vector<8xf32>
    %11 = vector.shape_cast %10 : vector<8xf32> to vector<8x1xf32>
    %cst_7 = arith.constant 3.125000e-02 : f32
    %12 = vector.broadcast %cst_7 : f32 to vector<8x1xf32>
    %13 = arith.mulf %11, %12 : vector<8x1xf32>
    %cst_8 = arith.constant 9.99999974E-6 : f32
    %14 = vector.broadcast %cst_8 : f32 to vector<8x1xf32>
    %15 = arith.addf %13, %14 : vector<8x1xf32>
    %16 = math.rsqrt %15 : vector<8x1xf32>
    %17 = vector.broadcast %16 : vector<8x1xf32> to vector<8x32xf32>
    %18 = arith.mulf %8, %17 : vector<8x32xf32>
    %19 = vector.broadcast %1 : vector<1x32xf32> to vector<8x32xf32>
    %20 = arith.mulf %18, %19 : vector<8x32xf32>
    %21 = vector.broadcast %2 : vector<1x32xf32> to vector<8x32xf32>
    %22 = arith.addf %20, %21 : vector<8x32xf32>
    %c0_9 = arith.constant 0 : index
    %c0_10 = arith.constant 0 : index
    %23 = vector.load %arg4[%c0_9, %c0_10] : memref<8x32xf32, #tpu.memory_space<vmem>>, vector<8x32xf32>
    tpu.vector_store %arg4[%c0_9, %c0_10], %22 {strides = array<i32>} : memref<8x32xf32, #tpu.memory_space<vmem>>, vector<8x32xf32>,
    return
  }
  func.func @transform_0(%arg0: i32) -> (i32, i32) {
    %c0_i32 = arith.constant 0 : i32
    %c0_i32_0 = arith.constant 0 : i32
    return %arg0, %c0_i32 : i32, i32
  }
  func.func @transform_1(%arg0: i32) -> (i32, i32) {
    %c0_i32 = arith.constant 0 : i32
    %c0_i32_0 = arith.constant 0 : i32
    %c0_i32_1 = arith.constant 0 : i32
    return %c0_i32, %c0_i32_0 : i32, i32
  }
  func.func @transform_2(%arg0: i32) -> (i32, i32) {
    %c0_i32 = arith.constant 0 : i32
    %c0_i32_0 = arith.constant 0 : i32
    %c0_i32_1 = arith.constant 0 : i32
    return %c0_i32, %c0_i32_0 : i32, i32
  }
  func.func @transform_3(%arg0: i32) -> (i32, i32) {
    %c0_i32 = arith.constant 0 : i32
    %c0_i32_0 = arith.constant 0 : i32
    return %arg0, %c0_i32 : i32, i32
  }
}

</mosaic_0001>

<bundles_post_ra>
// kernel: layer_norm.1
= control target key start
LH: loop header
LB: loop body
LE: loop exit
PB: predicated region body
PF: predicated region fallthrough
CT: control target
= control target key end

     0   :  { %8 = vsyncpa [#allocation3], 0  ;;  %s654_s0 = inlined_call_operand.hbm [shape: f32[16,32], index: 0, kind: input, shape index: {}]   ;;  %s655_s1 = inlined_call_operand.vmem [shape: f32[1,32], index: 1, kind: input, shape index: {}]   ;;  %s656_s2 = inlined_call_operand.vmem [shape: f32[1,32], index: 2, kind: input, shape index: {}]   ;;  %s657_s3 = inlined_call_operand.hbm [shape: f32[16,32], index: 3, kind: output, shape index: {}]  }
   0x1   :  { %10 = vsyncpa [#allocation3 + $0x1], 0 }
   0x2   :  { %11 = vsyncpa [#allocation4], 0 }
   0x3   :  { %13 = vsyncpa [#allocation4 + $0x1], 0  ;;  %s484_s12 = smov 0   ;;  %s486_s13 = smov 0  }
   0x4   :  { %s488_s14 = smov 0   ;;  %s490_s15 = smov 0  }
   0x5 LB: > { %s505_s16 = sadd.s32 4294967295, %s460_s15   ;;  %s302_s17 = sadd.s32 4294967294, %s460_s15   ;;  %s460_s15 = sphi %s490_s15, %s672_s15   ;;  %s456_s14 = sphi %s488_s14, %s671_s14   ;;  %s452_s13 = sphi %s486_s13, %s670_s13   ;;  %s448_s12 = sphi %s484_s12, %s669_s12  }
   0x6   : > { %s509_s18 = sadd.s32 1, %s460_s15   ;;  %s26_s19 = sadd.s32 1, %s456_s14 }
   0x7   : > { %s23_s20 = ssub.s32 %s460_s15, %s509_s18  ;;  %p33_p0 = scmp.ne.s32.totalorder %s456_s14, %s452_s13 }
   0x8   : > { %p24_p1 = scmp.eq.s32.totalorder %s23_s20, 0  ;;  %p34_p2 = scmp.eq.s32.totalorder %s460_s15, 0 }
   0x9   : > { %p39_p3 = scmp.ne.s32.totalorder %s452_s13, %s448_s12  ;;  %p40_p4 = scmp.eq.s32.totalorder %s505_s16, 0 }
   0xa   : > { %s521_s21 = scalar_select %p24_p1, %s456_s14, %s26_s19  }
   0xb   : > { %p523_p5 = por %p34_p2, %p33_p0  ;;  %p527_p6 = por %p40_p4, %p39_p3 }
   0xc   : > { %p105_p7 = scmp.eq.s32.totalorder %s505_s16, 1  ;;  %p111_p8 = scmp.eq.s32.totalorder %s302_s17, 1 }
   0xd   : > { %p328_p10 = scmp.lt.s32.totalorder %s460_s15, 2  ;;  %s137_s26 = sand.u32 1, %s456_s14  }
   0xe   : > { %p534_p11 = por %p105_p7, %p33_p0  ;;  %p538_p12 = por %p111_p8, %p39_p3 }
   0xf   : > { %s306_s27 = sshll.u32 %s460_s15, 7  ;;  %s305_s28 = sshll.u32 %s137_s26, 3 }
  0x10   : > { %s661_s24 = scalar_select %p534_p11, 1, 0 }
  0x11   : > { %s662_s25 = scalar_select %p538_p12, 1, 0 }
  0x12   : > { %s547_s4 = scalar_lea.hbm %s654_s0, %s306_s27  ;;  %s141_s5 = scalar_lea.vmem [#allocation2], %s305_s28 }
  0x13   : > { %s148_s6 = sshll.u32 %s141_s5, 4  ;;  %p551_p13 = pnand %p328_p10, %p523_p5  ;;  %s555_s6 = int_to_ptr.vmem [resolvable:$true] %s148_s6 }
  0x14   : > { %s138_s8 = scalar_lea.sflag [#allocation3], %s137_s26  ;;  %s364_s9 = scalar_lea.hbm %s547_s4, 128 }
  0x15   : > { %p365_p2 = scmp.ne.s32.totalorder %s547_s4, %s364_s9  ;;  %p366_p3 = pneg %p551_p13 }
  0x16   : > { %s369_s17 = scalar_lea.hbm %s654_s0, 256  ;;  %p370_p5 = scmp.lt.u32.totalorder %s547_s4, %s654_s0 }
  0x17   : > { %p367_p4 = pnand %p366_p3, %p365_p2  ;;  %p371_p8 = scmp.lt.u32.totalorder %s369_s17, %s364_s9 }
  0x18   : > { %p373_p9 = scmp.lt.u32.totalorder %s364_s9, %s547_s4 }
  0x19   : > { %p368_p7 = pneg %p367_p4  ;;  %p372_p10 = por %p371_p8, %p370_p5 }
  0x1b   : > { %p374_p0 = por %p373_p9, %p372_p10 }
  0x1d   : > { %p375_p1 = pnand %p374_p0, %p368_p7 }
  0x1f   : > { %378 = shalt.err (!%p375_p1)
}
  0x20   : > { %s379_s22 = scalar_lea.vmem %s555_s6, 128  ;;  %s462_s26 = smov [#allocation2]  }
  0x21   : > { %p380_p2 = scmp.ne.s32.totalorder %s555_s6, %s379_s22  ;;  %s384_s27 = sshll.u32 %s462_s26, 4  ;;  %s385_s27 = int_to_ptr.vmem [resolvable:$false] %s384_s27 }
  0x22   : > { %s386_s28 = scalar_lea.vmem %s385_s27, 256  ;;  %p387_p11 = scmp.lt.s32.totalorder %s555_s6, %s385_s27 }
  0x23   : > { %p382_p4 = pnand %p380_p2, %p366_p3  ;;  %p388_p5 = scmp.lt.s32.totalorder %s386_s28, %s379_s22 }
  0x25   : > { %p383_p12 = pneg %p382_p4  ;;  %p389_p8 = por %p388_p5, %p387_p11 }
  0x27   : > { %p390_p9 = pnand %p389_p8, %p383_p12 }
  0x29   : > { %393 = shalt.err (!%p390_p9)
}
  0x2a   : > { %323 = dma.hbm_to_vmem [thread:$0]  (!%p551_p13), %s547_s4, 128, %s555_s6, %s138_s8  }
  0x2b   : > { %p664_p0 = scmp.lt.s32.totalorder %s460_s15, 3  ;;  %p665_p1 = scmp.ge.s32.totalorder %s460_s15, 1 }
  0x2d   : > { %p154_p3 = pnand %p665_p1, %p664_p0 }
  0x2e   : > { %s589_s29 = sand.u32 (!%p154_p3), 1, %s452_s13  }
  0x2f   : > { %157 = sbr.rel (%p154_p3) target bundleno = 383 (0x17f), region = 32  ;;  %s308_s30 = sshll.u32 (!%p154_p3), %s589_s29, 3 }
  0x30   : > { %s160_s5 = scalar_lea.sflag (!%p154_p3), [#allocation3], %s589_s29  ;;  %s163_s9 = scalar_lea.vmem (!%p154_p3), [#allocation2], %s308_s30 }
  0x36   : > { %439 = dma.done.wait (%p527_p6), %s160_s5, 128  }
  0x37   : > { %441 = vsyncadd (%p527_p6), %s160_s5, 4294967168  ;;  %vm189_vm0 = vcmask 261120   ;;  %v186_v0 = vld [vmem:[%s163_s9] sm:$0xff]  ;;  %s313_s8 = sshll.u32 %s505_s16, 7  ;;  %s185_s10 = scalar_lea.vmem [#allocation5], %s308_s30 }
  0x38   : > { %v190_v1 = vsel %vm189_vm0, %v186_v0, 0.0  ;;  %v310_v11 = vld [vmem:[%s655_s1] ss:$0 sm:$0xff]  ;;  %s232_s11 = sshll.u32 %s185_s10, 4  ;;  %s609_s20 = scalar_lea.hbm %s657_s3, %s313_s8  ;;  %s611_s11 = int_to_ptr.vmem [resolvable:$true] %s232_s11 }
  0x39   : > { %191 = vadd.xlane.f32.xlu0 %v190_v1  ;;  %v311_v13 = vld [vmem:[%s656_s2] ss:$0 sm:$0xff]  ;;  %s219_s22 = scalar_lea.sflag [#allocation4], %s589_s29  ;;  %s394_s26 = scalar_lea.vmem %s611_s11, 128 }
  0x3a   : > { %p395_p6 = scmp.ne.s32.totalorder %s611_s11, %s394_s26  ;;  %p666_p11 = scmp.ne.s32.totalorder %s661_s24, 0 }
  0x3b   : > { %s463_s16 = smov [#allocation5]  }
  0x3c   : > { %p396_p12 = pnand %p395_p6, %p666_p11  ;;  %s398_s27 = sshll.u32 %s463_s16, 4  ;;  %s399_s27 = int_to_ptr.vmem [resolvable:$false] %s398_s27 }
  0x3d   : > { %s400_s28 = scalar_lea.vmem %s399_s27, 256  ;;  %p401_p7 = scmp.lt.s32.totalorder %s611_s11, %s399_s27 }
  0x3e   : > { %p397_p13 = pneg %p396_p12  ;;  %p402_p10 = scmp.lt.s32.totalorder %s400_s28, %s394_s26 }
  0x40   : > { %p403_p2 = por %p402_p10, %p401_p7 }
  0x42   : > { %p404_p4 = pnand %p403_p2, %p397_p13 }
  0xc6   : > { %v192_v2 = vpop.xlane.xlu0 %191 }
  0xc7   : > { %v193_v3 = vmul.f32 0.03125, %v192_v2 }
  0xc9   : > { %v194_v4 = vsub.f32 %v186_v0, %v193_v3 }
  0xcb   : > { %v195_v5 = vmul.f32 %v194_v4, %v194_v4 }
  0xcd   : > { %v196_v6 = vsel %vm189_vm0, %v195_v5, 0.0 }
  0xce   : > { %197 = vadd.xlane.f32.xlu0 %v196_v6 }
 0x15b   : > { %v198_v7 = vpop.xlane.xlu0 %197 }
 0x15c   : > { %v199_v8 = vmul.f32 0.03125, %v198_v7 }
 0x15e   : > { %v200_v9 = vadd.f32 1e-05, %v199_v8 }
 0x160   : > { %362 = vrsqrt.f32 %v200_v9 }
 0x16a   : > { %v363_v10 = vpop.eup %362 }
 0x16b   : > { %v202_v12 = vmul.f32 %v363_v10, %v194_v4 }
 0x16d   : > { %v209_v14 = vmul.f32 %v310_v11, %v202_v12 }
 0x16f   : > { %v216_v15 = vadd.f32 %v311_v13, %v209_v14 }
 0x171   : > { %217 = vst.msk [vmem:[%s185_s10] sm:$0xff] %vm189_vm0, %v216_v15 }
 0x172   : > { %407 = shalt.err (!%p404_p4)
}
 0x173   : > { %s408_s29 = scalar_lea.hbm %s609_s20, 128  ;;  %s412_s9 = scalar_lea.hbm %s657_s3, 256 }
 0x174   : > { %p409_p5 = scmp.ne.s32.totalorder %s609_s20, %s408_s29  ;;  %p413_p0 = scmp.lt.u32.totalorder %s609_s20, %s657_s3 }
 0x175   : > { %p414_p1 = scmp.lt.u32.totalorder %s412_s9, %s408_s29  ;;  %p416_p6 = scmp.lt.u32.totalorder %s408_s29, %s609_s20 }
 0x176   : > { %p410_p8 = pnand %p409_p5, %p666_p11 }
 0x177   : > { %p415_p3 = por %p414_p1, %p413_p0 }
 0x178   : > { %p411_p9 = pneg %p410_p8 }
 0x179   : > { %p417_p12 = por %p416_p6, %p415_p3 }
 0x17b   : > { %p418_p13 = pnand %p417_p12, %p411_p9 }
 0x17d   : > { %421 = shalt.err (!%p418_p13)
}
 0x17e   : > { %318 = dma.vmem_to_hbm [thread:$0]  (%p666_p11), %s611_s11, 128, %s609_s20, %s219_s22  }
 0x17f PF: > { %s244_s6 = sand.u32 1, %s448_s12   ;;  %p667_p7 = scmp.ne.s32.totalorder %s662_s25, 0 }
 0x180   : > { %p668_p10 = scmp.ge.s32.totalorder %s460_s15, 2  ;;  %s245_s7 = scalar_lea.sflag [#allocation4], %s244_s6 }
 0x182   : > { %p325_p2 = pnand %p668_p10, %p667_p7 }
 0x184   : > { %443 = dma.done.wait (!%p325_p2), %s245_s7, 128  }
 0x185   : > { %445 = vsyncadd (!%p325_p2), %s245_s7, 4294967168  ;;  %p16_p4 = scmp.ge.s32.totalorder %s509_s18, 4   ;;  %s669_s12 = smov %s452_s13 }
 0x186   : > { %s670_s13 = smov %s456_s14  ;;  %s671_s14 = smov %s521_s21 }
 0x187   : > { %s672_s15 = smov %s509_s18  ;;  %18 = sbr.rel (!%p16_p4) target bundleno = 5 (0x5), region = 77 }
 0x18e   :  { %250 = vsyncpa [#allocation3], 1 }
 0x18f   :  { %252 = vsyncpa [#allocation3 + $0x1], 1 }
 0x190   :  { %253 = vsyncpa [#allocation4], 1 }
 0x191   :  { %255 = vsyncpa [#allocation4 + $0x1], 1 }

</bundles_post_ra>
